<compile_context>
chip_gen: v5e
topology: v5e:2x2
jax: 0.10.0
libtpu: 0.0.40
codegen_flags: <defaults>
</compile_context>

<pallas_src>
import functools

import jax
import jax.numpy as jnp
from jax.experimental import pallas as pl
from jax.experimental.pallas import tpu as pltpu

DIM_Z = 32          # dim_z for the example (small latent)
HIDDEN = 500        # fixed by the module definition
HIDDEN_PAD = 512    # hidden padded to a multiple of 128 for lane-dense MXU work


def _round_up(x, m):
    return ((x + m - 1) // m) * m


def _is_two_tensorcore_chip():
    """True on chips with 2 TensorCores (v7x), where we want >=2 grid steps."""
    try:
        kind = jax.devices()[0].device_kind.lower()
    except Exception:
        return False
    return ("v7" in kind) or ("7x" in kind)


def pz_kernel(z_ref, w1_ref, b1_ref, w2_ref, b2_ref, o_ref):
    # z tile: (TB, dim_z) f32 ; w1: (dim_z, 512) bf16 ; b1: (1, 512) f32
    # w2: (512, 500) bf16 ; b2: (1, 500) f32 ; o: (TB, 500)
    z = z_ref[...].astype(jnp.bfloat16)
    h = jnp.dot(z, w1_ref[...], preferred_element_type=jnp.float32)    # (TB, 512)
    h = jnp.maximum(h + b1_ref[...], 0.0)                              # ReLU, f32
    y = jnp.dot(h.astype(jnp.bfloat16), w2_ref[...],
                preferred_element_type=jnp.float32)                    # (TB, 500)
    y = y + b2_ref[...]
    # sigmoid(y) == 0.5 * tanh(0.5 * y) + 0.5  -> one EUP transcendental
    o_ref[...] = (0.5 * jnp.tanh(0.5 * y) + 0.5).astype(o_ref.dtype)


def pz_forward(z, w1, b1, w2, b2, *, max_tb=1024, out_dtype=jnp.float32):
    """z: (B, dim_z) f32; w1: (dim_z, 512) bf16; b1: (1, 512) f32;
    w2: (512, 500) bf16; b2: (1, 500) f32. Returns (B, 500) in out_dtype."""
    B, dz = z.shape

    # Batch tile: multiple of 8 (sublane), capped at max_tb.
    TB = min(max_tb, _round_up(B, 8))

    # v7x only: if everything would land in a single grid step, split the batch
    # so dimension_semantics=("parallel",) can shard across both TensorCores.
    if _is_two_tensorcore_chip() and B >= 16 and B <= TB:
        TB = max(8, _round_up(-(-B // 2), 8))

    B_pad = _round_up(B, TB)
    if B_pad != B:
        z = jnp.pad(z, ((0, B_pad - B), (0, 0)))

    out_bytes = jnp.dtype(out_dtype).itemsize
    cost = pl.CostEstimate(
        flops=2 * B_pad * (dz * HIDDEN_PAD + HIDDEN_PAD * HIDDEN),
        transcendentals=B_pad * HIDDEN,
        bytes_accessed=(B_pad * dz * 4 + B_pad * HIDDEN * out_bytes
                        + w1.size * 2 + w2.size * 2 + b1.size * 4 + b2.size * 4),
    )

    out = pl.pallas_call(
        pz_kernel,
        out_shape=jax.ShapeDtypeStruct((B_pad, HIDDEN), out_dtype),
        grid=(B_pad // TB,),
        in_specs=[
            pl.BlockSpec((TB, dz), lambda i: (i, 0)),                  # z tile
            pl.BlockSpec((dz, HIDDEN_PAD), lambda i: (0, 0)),          # w1 (resident)
            pl.BlockSpec((1, HIDDEN_PAD), lambda i: (0, 0)),           # b1 (resident)
            pl.BlockSpec((HIDDEN_PAD, HIDDEN), lambda i: (0, 0)),      # w2 (resident)
            pl.BlockSpec((1, HIDDEN), lambda i: (0, 0)),               # b2 (resident)
        ],
        out_specs=pl.BlockSpec((TB, HIDDEN), lambda i: (i, 0)),
        compiler_params=pltpu.CompilerParams(
            dimension_semantics=("parallel",),
            vmem_limit_bytes=32 * 1024 * 1024,
        ),
        cost_estimate=cost,
    )(z, w1, b1, w2, b2)

    # Only batch padding (if any) needs removing; feature axis is already 500.
    return out if B_pad == B else out[:B]


def init_params(key, dim_z):
    """Synthetic nn.Linear-style init. Returns:
      w1: (dim_z, 512) bf16   (out-features zero-padded 500->512)
      b1: (1, 512)     f32    (zero-padded)
      w2: (512, 500)   bf16   (in-features zero-padded 500->512)
      b2: (1, 500)     f32
    Zero padding guarantees h[:, 500:512] == 0, so padded w2 rows contribute
    nothing and the 500 real output lanes are exact."""
    k1, k2, k3, k4 = jax.random.split(key, 4)
    bound1 = 1.0 / jnp.sqrt(dim_z)
    bound2 = 1.0 / jnp.sqrt(HIDDEN)

    # PyTorch stores weight as (out, in).
    w1_t = jax.random.uniform(k1, (HIDDEN, dim_z), jnp.float32, -bound1, bound1)
    b1 = jax.random.uniform(k2, (1, HIDDEN), jnp.float32, -bound1, bound1)
    w2_t = jax.random.uniform(k3, (HIDDEN, HIDDEN), jnp.float32, -bound2, bound2)
    b2 = jax.random.uniform(k4, (1, HIDDEN), jnp.float32, -bound2, bound2)

    pad = HIDDEN_PAD - HIDDEN
    w1_p = jnp.pad(w1_t, ((0, pad), (0, 0))).T           # (dim_z, 512)
    b1_p = jnp.pad(b1, ((0, 0), (0, pad)))               # (1, 512)
    w2_p = jnp.pad(w2_t, ((0, 0), (0, pad))).T           # (512, 500)

    return (w1_p.astype(jnp.bfloat16), b1_p,
            w2_p.astype(jnp.bfloat16), b2)


def reference_forward(z, w1, b1, w2, b2):
    """Pure-JAX reference using the same bf16 weights / f32 accumulation."""
    h = jnp.dot(z.astype(jnp.bfloat16), w1,
                preferred_element_type=jnp.float32) + b1
    h = jnp.maximum(h, 0.0)
    y = jnp.dot(h.astype(jnp.bfloat16), w2,
                preferred_element_type=jnp.float32) + b2
    return jax.nn.sigmoid(y)


if __name__ == "__main__":
    key = jax.random.PRNGKey(0)
    kz, kz2, kp = jax.random.split(key, 3)
    w1, b1, w2, b2 = init_params(kp, DIM_Z)

    # Small primary check (B=2): single grid step.
    B = 2
    z = jax.random.normal(kz, (B, DIM_Z), jnp.float32)
    out = jax.block_until_ready(pz_forward(z, w1, b1, w2, b2))
    ref = reference_forward(z, w1, b1, w2, b2)
    assert out.shape == (B, HIDDEN)
    assert jnp.allclose(out, ref, atol=2e-3, rtol=2e-3), \
        "mismatch vs pure-JAX reference (B=2)"

    # Secondary check exercising a multi-step grid + batch padding path.
    B2 = 40
    z2 = jax.random.normal(kz2, (B2, DIM_Z), jnp.float32)
    out2 = jax.block_until_ready(pz_forward(z2, w1, b1, w2, b2, max_tb=16))
    ref2 = reference_forward(z2, w1, b1, w2, b2)
    assert out2.shape == (B2, HIDDEN)
    assert jnp.allclose(out2, ref2, atol=2e-3, rtol=2e-3), \
        "mismatch vs pure-JAX reference (B=40, tiled)"

    print("KERNEL_OK")
</pallas_src>

<mosaic_0001>
module attributes {stable_mosaic.version = 11 : i64} {
  func.func @pz_kernel(%arg0: i32, %arg1: memref<8x32xf32, #tpu.memory_space<vmem>>, %arg2: memref<32x512xbf16, #tpu.memory_space<vmem>>, %arg3: memref<1x512xf32, #tpu.memory_space<vmem>>, %arg4: memref<512x500xbf16, #tpu.memory_space<vmem>>, %arg5: memref<1x500xf32, #tpu.memory_space<vmem>>, %arg6: memref<8x500xf32, #tpu.memory_space<vmem>>) attributes {dimension_semantics = [#tpu.dimension_semantics<parallel>], iteration_bounds = array<i64: 1>, scalar_prefetch = 0 : i64, scratch_operands = 0 : i64, tpu.core_type = #tpu.core_type<tc>, window_params = [{transform_indices = @transform_0, window_bounds = array<i64: 8, 32>}, {pipeline_mode = #tpu.pipeline_mode<synchronous>, transform_indices = @transform_1, window_bounds = array<i64: 32, 512>}, {pipeline_mode = #tpu.pipeline_mode<synchronous>, transform_indices = @transform_2, window_bounds = array<i64: 1, 512>}, {pipeline_mode = #tpu.pipeline_mode<synchronous>, transform_indices = @transform_3, window_bounds = array<i64: 512, 500>}, {pipeline_mode = #tpu.pipeline_mode<synchronous>, transform_indices = @transform_4, window_bounds = array<i64: 1, 500>}, {transform_indices = @transform_5, window_bounds = array<i64: 8, 500>}]} {
    %c0 = arith.constant 0 : index
    %c0_0 = arith.constant 0 : index
    %0 = vector.load %arg1[%c0, %c0_0] : memref<8x32xf32, #tpu.memory_space<vmem>>, vector<8x32xf32>
    %1 = arith.truncf %0 : vector<8x32xf32> to vector<8x32xbf16>
    %c0_1 = arith.constant 0 : index
    %c0_2 = arith.constant 0 : index
    %2 = vector.load %arg2[%c0_1, %c0_2] : memref<32x512xbf16, #tpu.memory_space<vmem>>, vector<32x512xbf16>
    %cst = arith.constant dense<0.000000e+00> : vector<8x512xf32>
    %3 = tpu.matmul %1, %2, %cst {dimension_numbers = #tpu.dot_dimension_numbers<[1], [0], [0], [1], [0, 0, 1, 1], [], []>} : vector<8x32xbf16>, vector<32x512xbf16>, vector<8x512xf32> -> vector<8x512xf32>
    %c0_3 = arith.constant 0 : index
    %c0_4 = arith.constant 0 : index
    %4 = vector.load %arg3[%c0_3, %c0_4] : memref<1x512xf32, #tpu.memory_space<vmem>>, vector<1x512xf32>
    %5 = vector.broadcast %4 : vector<1x512xf32> to vector<8x512xf32>
    %6 = arith.addf %3, %5 : vector<8x512xf32>
    %cst_5 = arith.constant 0.000000e+00 : f32
    %7 = vector.broadcast %cst_5 : f32 to vector<8x512xf32>
    %8 = arith.maximumf %6, %7 : vector<8x512xf32>
    %9 = arith.truncf %8 : vector<8x512xf32> to vector<8x512xbf16>
    %c0_6 = arith.constant 0 : index
    %c0_7 = arith.constant 0 : index
    %10 = vector.load %arg4[%c0_6, %c0_7] : memref<512x500xbf16, #tpu.memory_space<vmem>>, vector<512x500xbf16>
    %cst_8 = arith.constant dense<0.000000e+00> : vector<8x500xf32>
    %11 = tpu.matmul %9, %10, %cst_8 {dimension_numbers = #tpu.dot_dimension_numbers<[1], [0], [0], [1], [0, 0, 1, 1], [], []>} : vector<8x512xbf16>, vector<512x500xbf16>, vector<8x500xf32> -> vector<8x500xf32>
    %c0_9 = arith.constant 0 : index
    %c0_10 = arith.constant 0 : index
    %12 = vector.load %arg5[%c0_9, %c0_10] : memref<1x500xf32, #tpu.memory_space<vmem>>, vector<1x500xf32>
    %13 = vector.broadcast %12 : vector<1x500xf32> to vector<8x500xf32>
    %14 = arith.addf %11, %13 : vector<8x500xf32>
    %cst_11 = arith.constant 5.000000e-01 : f32
    %15 = vector.broadcast %cst_11 : f32 to vector<8x500xf32>
    %16 = arith.mulf %15, %14 : vector<8x500xf32>
    %17 = math.tanh %16 : vector<8x500xf32>
    %cst_12 = arith.constant 5.000000e-01 : f32
    %18 = vector.broadcast %cst_12 : f32 to vector<8x500xf32>
    %19 = arith.mulf %18, %17 : vector<8x500xf32>
    %cst_13 = arith.constant 5.000000e-01 : f32
    %20 = vector.broadcast %cst_13 : f32 to vector<8x500xf32>
    %21 = arith.addf %19, %20 : vector<8x500xf32>
    %c0_14 = arith.constant 0 : index
    %c0_15 = arith.constant 0 : index
    %22 = vector.load %arg6[%c0_14, %c0_15] : memref<8x500xf32, #tpu.memory_space<vmem>>, vector<8x500xf32>
    tpu.vector_store %arg6[%c0_14, %c0_15], %21 {strides = array<i32>} : memref<8x500xf32, #tpu.memory_space<vmem>>, vector<8x500xf32>,
    return
  }
  func.func @transform_0(%arg0: i32) -> (i32, i32) {
    %c0_i32 = arith.constant 0 : i32
    %c0_i32_0 = arith.constant 0 : i32
    return %arg0, %c0_i32 : i32, i32
  }
  func.func @transform_1(%arg0: i32) -> (i32, i32) {
    %c0_i32 = arith.constant 0 : i32
    %c0_i32_0 = arith.constant 0 : i32
    %c0_i32_1 = arith.constant 0 : i32
    return %c0_i32, %c0_i32_0 : i32, i32
  }
  func.func @transform_2(%arg0: i32) -> (i32, i32) {
    %c0_i32 = arith.constant 0 : i32
    %c0_i32_0 = arith.constant 0 : i32
    %c0_i32_1 = arith.constant 0 : i32
    return %c0_i32, %c0_i32_0 : i32, i32
  }
  func.func @transform_3(%arg0: i32) -> (i32, i32) {
    %c0_i32 = arith.constant 0 : i32
    %c0_i32_0 = arith.constant 0 : i32
    %c0_i32_1 = arith.constant 0 : i32
    return %c0_i32, %c0_i32_0 : i32, i32
  }
  func.func @transform_4(%arg0: i32) -> (i32, i32) {
    %c0_i32 = arith.constant 0 : i32
    %c0_i32_0 = arith.constant 0 : i32
    %c0_i32_1 = arith.constant 0 : i32
    return %c0_i32, %c0_i32_0 : i32, i32
  }
  func.func @transform_5(%arg0: i32) -> (i32, i32) {
    %c0_i32 = arith.constant 0 : i32
    %c0_i32_0 = arith.constant 0 : i32
    return %arg0, %c0_i32 : i32, i32
  }
}

</mosaic_0001>

<bundles_post_ra>
// kernel: tpu_custom_call.1
= control target key start
LH: loop header
LB: loop body
LE: loop exit
PB: predicated region body
PF: predicated region fallthrough
CT: control target
= control target key end

     0   :  { %vm82_vm0 = vcmask 261120   ;;  %s2775_s0 = inlined_call_operand.vmem [shape: f32[8,32], index: 0, kind: input, shape index: {}]   ;;  %s2776_s1 = inlined_call_operand.vmem [shape: bf16[32,512], index: 1, kind: input, shape index: {}]   ;;  %s2777_s2 = inlined_call_operand.vmem [shape: f32[1,512], index: 2, kind: input, shape index: {}]   ;;  %s2778_s3 = inlined_call_operand.vmem [shape: bf16[512,500], index: 3, kind: input, shape index: {}]   ;;  %s2779_s4 = inlined_call_operand.vmem [shape: f32[1,500], index: 4, kind: input, shape index: {}]   ;;  %s2780_s5 = inlined_call_operand.hbm [shape: f32[8,500], index: 5, kind: output, shape index: {}]  }
   0x1   :  { %v1187_v0 = vld [vmem:[%s2776_s1 + $0x20] sm:$0xf]  ;;  %v1723_v1 = vld [vmem:[%s2776_s1 + $0x2c] sm:$0xf0]  ;;  %v1721_v2 = vld [vmem:[%s2776_s1 + $0x24] sm:$0xf] }
   0x2   :  { %v1188_v3 = vor.u32 %v1723_v1, %v1187_v0  ;;  %v1189_v4 = vld [vmem:[%s2776_s1 + $0x30] sm:$0xf0]  ;;  %v1195_v5 = vld [vmem:[%s2776_s1 + $0x28] sm:$0xf]  ;;  %v1724_v6 = vld [vmem:[%s2776_s1 + $0x34] sm:$0xf0] }
   0x3   :  { %v1192_v7 = vor.u32 %v1721_v2, %v1189_v4  ;;  %v1196_v8 = vor.u32 %v1724_v6, %v1195_v5  ;;  %v1722_v9 = vld [vmem:[%s2776_s1 + $0x2c] sm:$0xf]  ;;  %v1197_v10 = vld [vmem:[%s2776_s1 + $0x38] sm:$0xf0]  ;;  %v1171_v11 = vld [vmem:[%s2776_s1] sm:$0xf] }
   0x4   :  { %92 = vmatpush.bf16.msra.mxu0 %v1188_v3  ;;  %v1200_v12 = vor.u32 %v1722_v9, %v1197_v10  ;;  %v1719_v13 = vld [vmem:[%s2776_s1 + $0xc] sm:$0xf0]  ;;  %v1717_v14 = vld [vmem:[%s2776_s1 + $0x4] sm:$0xf]  ;;  %v1173_v15 = vld [vmem:[%s2776_s1 + $0x10] sm:$0xf0] }
   0x5   :  { %105 = vmatpush.bf16.msra.mxu1 %v1192_v7  ;;  %118 = vmatpush.bf16.msra.mxu2 %v1196_v8  ;;  %v1172_v16 = vor.u32 %v1719_v13, %v1171_v11  ;;  %v1176_v17 = vor.u32 %v1717_v14, %v1173_v15  ;;  %v1179_v18 = vld [vmem:[%s2776_s1 + $0x8] sm:$0xf]  ;;  %v1720_v19 = vld [vmem:[%s2776_s1 + $0x14] sm:$0xf0]  ;;  %v1718_v20 = vld [vmem:[%s2776_s1 + $0xc] sm:$0xf] }
   0x6   :  { %131 = vmatpush.bf16.msra.mxu3 %v1200_v12  ;;  %v1180_v21 = vor.u32 %v1720_v19, %v1179_v18  ;;  %v1181_v22 = vld [vmem:[%s2776_s1 + $0x18] sm:$0xf0]  ;;  %v22_v23 = vld [vmem:[%s2775_s0] sm:$0xff]  ;;  %v1755_v27 = vld [vmem:[%s2778_s3 + $0xec] sm:$0xf0] }
   0x7   :  { %v1319_v24 = vld [vmem:[%s2778_s3 + $0xe0] sm:$0xf]  ;;  %v1184_v25 = vor.u32 %v1718_v20, %v1181_v22  ;;  %v23_v26 = vpack.c.bf16 %v22_v23, %v22_v23  ;;  %v1787_v29 = vld [vmem:[%s2778_s3 + $0x1ec] sm:$0xf0] }
   0x8   :  { %v1447_v28 = vld [vmem:[%s2778_s3 + $0x1e0] sm:$0xf]  ;;  %93 = vmatpush.bf16.msra.mxu0 %v1172_v16  ;;  %v1320_v30 = vor.u32 %v1755_v27, %v1319_v24  ;;  %v1751_v33 = vld [vmem:[%s2778_s3 + $0xcc] sm:$0xf0] }
   0x9   :  { %v1448_v31 = vor.u32 %v1787_v29, %v1447_v28  ;;  %v1303_v32 = vld [vmem:[%s2778_s3 + $0xc0] sm:$0xf]  ;;  %106 = vmatpush.bf16.msra.mxu1 %v1176_v17  ;;  %119 = vmatpush.bf16.msra.mxu2 %v1180_v21  ;;  %v1783_v35 = vld [vmem:[%s2778_s3 + $0x1cc] sm:$0xf0] }
   0xa   :  { %v1431_v34 = vld [vmem:[%s2778_s3 + $0x1c0] sm:$0xf]  ;;  %v1819_v37 = vld [vmem:[%s2778_s3 + $0x2ec] sm:$0xf0]  ;;  %132 = vmatpush.bf16.msra.mxu3 %v1184_v25  ;;  %v1304_v38 = vor.u32 %v1751_v33, %v1303_v32 }
   0xb   :  { %v1575_v36 = vld [vmem:[%s2778_s3 + $0x2e0] sm:$0xf]  ;;  %v1851_v41 = vld [vmem:[%s2778_s3 + $0x3ec] sm:$0xf0]  ;;  %1201 = vmatmul.msk.bf16.vlgmr.msra.gmra.mxu0 %vm82_vm0, %v23_v26  ;;  %v1432_v43 = vor.u32 %v1783_v35, %v1431_v34 }
   0xc   :  { %924 = vmatpush.bf16.msrb.mxu0 %v1320_v30  ;;  %v1576_v39 = vor.u32 %v1819_v37, %v1575_v36  ;;  %v1703_v40 = vld [vmem:[%s2778_s3 + $0x3e0] sm:$0xf]  ;;  %v1747_v45 = vld [vmem:[%s2778_s3 + $0xac] sm:$0xf0]  ;;  %1202 = vmatmul.msk.bf16.vlgmr.msra.gmra.mxu1 %vm82_vm0, %v23_v26 }
   0xd   :  { %v1287_v42 = vld [vmem:[%s2778_s3 + $0xa0] sm:$0xf]  ;;  %937 = vmatpush.bf16.msrb.mxu1 %v1448_v31  ;;  %v1704_v44 = vor.u32 %v1851_v41, %v1703_v40  ;;  %v1779_v47 = vld [vmem:[%s2778_s3 + $0x1ac] sm:$0xf0]  ;;  %1203 = vmatmul.msk.bf16.vlgmr.msra.gmra.mxu2 %vm82_vm0, %v23_v26 }
   0xe   :  { %v1415_v46 = vld [vmem:[%s2778_s3 + $0x1a0] sm:$0xf]  ;;  %v1815_v49 = vld [vmem:[%s2778_s3 + $0x2cc] sm:$0xf0]  ;;  %1204 = vmatmul.msk.bf16.vlgmr.msra.gmra.mxu3 %vm82_vm0, %v23_v26  ;;  %950 = vmatpush.bf16.msrb.mxu2 %v1576_v39  ;;  %v1288_v53 = vor.u32 %v1747_v45, %v1287_v42 }
   0xf   :  { %v1559_v48 = vld [vmem:[%s2778_s3 + $0x2c0] sm:$0xf]  ;;  %v1847_v52 = vld [vmem:[%s2778_s3 + $0x3cc] sm:$0xf0]  ;;  %963 = vmatpush.bf16.msrb.mxu3 %v1704_v44  ;;  %v1416_v58 = vor.u32 %v1779_v47, %v1415_v46 }
  0x10   :  { %v1687_v50 = vld [vmem:[%s2778_s3 + $0x3c0] sm:$0xf]  ;;  %v1560_v51 = vor.u32 %v1815_v49, %v1559_v48  ;;  %925 = vmatpush.bf16.msrb.mxu0 %v1304_v38  ;;  %v1743_v56 = vld [vmem:[%s2778_s3 + $0x8c] sm:$0xf0]  ;;  %v1753_v48 = vld [vmem:[%s2778_s3 + $0xe4] sm:$0xf] }
  0x11   :  { %v1688_v54 = vor.u32 %v1847_v52, %v1687_v50  ;;  %v1271_v55 = vld [vmem:[%s2778_s3 + $0x80] sm:$0xf]  ;;  %938 = vmatpush.bf16.msrb.mxu1 %v1432_v43  ;;  %v1811_v59 = vld [vmem:[%s2778_s3 + $0x2ac] sm:$0xf0]  ;;  %v1321_v49 = vld [vmem:[%s2778_s3 + $0xf0] sm:$0xf0] }
  0x12   :  { %v1543_v57 = vld [vmem:[%s2778_s3 + $0x2a0] sm:$0xf]  ;;  %v1843_v61 = vld [vmem:[%s2778_s3 + $0x3ac] sm:$0xf0]  ;;  %951 = vmatpush.bf16.msrb.mxu2 %v1560_v51  ;;  %v1272_v1 = vor.u32 %v1743_v56, %v1271_v55  ;;  %v1785_v50 = vld [vmem:[%s2778_s3 + $0x1e4] sm:$0xf] }
  0x13   :  { %v1671_v60 = vld [vmem:[%s2778_s3 + $0x3a0] sm:$0xf]  ;;  %v1775_v63 = vld [vmem:[%s2778_s3 + $0x18c] sm:$0xf0]  ;;  %v1544_v0 = vor.u32 %v1811_v59, %v1543_v57  ;;  %964 = vmatpush.bf16.msrb.mxu3 %v1688_v54  ;;  %v1449_v51 = vld [vmem:[%s2778_s3 + $0x1f0] sm:$0xf0] }
  0x14   :  { %v1399_v62 = vld [vmem:[%s2778_s3 + $0x180] sm:$0xf]  ;;  %926 = vmatpush.bf16.msrb.mxu0 %v1288_v53  ;;  %v1672_v2 = vor.u32 %v1843_v61, %v1671_v60  ;;  %v1807_v5 = vld [vmem:[%s2778_s3 + $0x28c] sm:$0xf0]  ;;  %v1749_v55 = vld [vmem:[%s2778_s3 + $0xc4] sm:$0xf]  ;;  %v1324_v60 = vor.u32 %v1753_v48, %v1321_v49 }
  0x15   :  { %v1255_v3 = vld [vmem:[%s2778_s3 + $0x60] sm:$0xf]  ;;  %939 = vmatpush.bf16.msrb.mxu1 %v1416_v58  ;;  %v1400_v6 = vor.u32 %v1775_v63, %v1399_v62  ;;  %v1739_v7 = vld [vmem:[%s2778_s3 + $0x6c] sm:$0xf0]  ;;  %v1817_v62 = vld [vmem:[%s2778_s3 + $0x2e4] sm:$0xf] }
  0x16   :  { %v1527_v4 = vld [vmem:[%s2778_s3 + $0x280] sm:$0xf]  ;;  %v1839_v9 = vld [vmem:[%s2778_s3 + $0x38c] sm:$0xf0]  ;;  %952 = vmatpush.bf16.msrb.mxu2 %v1544_v0  ;;  %v1256_v13 = vor.u32 %v1739_v7, %v1255_v3  ;;  %v1577_v63 = vld [vmem:[%s2778_s3 + $0x2f0] sm:$0xf0]  ;;  %v1452_v0 = vor.u32 %v1785_v50, %v1449_v51 }
  0x17   :  { %v1655_v8 = vld [vmem:[%s2778_s3 + $0x380] sm:$0xf]  ;;  %v1771_v11 = vld [vmem:[%s2778_s3 + $0x16c] sm:$0xf0]  ;;  %v1528_v12 = vor.u32 %v1807_v5, %v1527_v4  ;;  %965 = vmatpush.bf16.msrb.mxu3 %v1672_v2  ;;  %v1849_v2 = vld [vmem:[%s2778_s3 + $0x3e4] sm:$0xf] }
  0x18   :  { %v1383_v10 = vld [vmem:[%s2778_s3 + $0x160] sm:$0xf]  ;;  %927 = vmatpush.bf16.msrb.mxu0 %v1272_v1  ;;  %v1656_v14 = vor.u32 %v1839_v9, %v1655_v8  ;;  %v1803_v17 = vld [vmem:[%s2778_s3 + $0x26c] sm:$0xf0]  ;;  %v1305_v1 = vld [vmem:[%s2778_s3 + $0xd0] sm:$0xf0]  ;;  %v1580_v8 = vor.u32 %v1817_v62, %v1577_v63 }
  0x19   :  { %v1239_v15 = vld [vmem:[%s2778_s3 + $0x40] sm:$0xf]  ;;  %940 = vmatpush.bf16.msrb.mxu1 %v1400_v6  ;;  %v1384_v18 = vor.u32 %v1771_v11, %v1383_v10  ;;  %v1735_v19 = vld [vmem:[%s2778_s3 + $0x4c] sm:$0xf0]  ;;  %v1705_v3 = vld [vmem:[%s2778_s3 + $0x3f0] sm:$0xf0]  ;;  %v1308_v9 = vor.u32 %v1749_v55, %v1305_v1 }
  0x1a   :  { %v1511_v16 = vld [vmem:[%s2778_s3 + $0x260] sm:$0xf]  ;;  %v1835_v21 = vld [vmem:[%s2778_s3 + $0x36c] sm:$0xf0]  ;;  %953 = vmatpush.bf16.msrb.mxu2 %v1528_v12  ;;  %v1240_v25 = vor.u32 %v1735_v19, %v1239_v15  ;;  %v1781_v4 = vld [vmem:[%s2778_s3 + $0x1c4] sm:$0xf]  ;;  %v1708_v10 = vor.u32 %v1849_v2, %v1705_v3 }
  0x1b   :  { %v1639_v20 = vld [vmem:[%s2778_s3 + $0x360] sm:$0xf]  ;;  %v1767_v23 = vld [vmem:[%s2778_s3 + $0x14c] sm:$0xf0]  ;;  %v1512_v24 = vor.u32 %v1803_v17, %v1511_v16  ;;  %966 = vmatpush.bf16.msrb.mxu3 %v1656_v14  ;;  %v1433_v5 = vld [vmem:[%s2778_s3 + $0x1d0] sm:$0xf0] }
  0x1c   :  { %v1367_v22 = vld [vmem:[%s2778_s3 + $0x140] sm:$0xf]  ;;  %928 = vmatpush.bf16.msrb.mxu0 %v1256_v13  ;;  %v1640_v26 = vor.u32 %v1835_v21, %v1639_v20  ;;  %v1799_v29 = vld [vmem:[%s2778_s3 + $0x24c] sm:$0xf0]  ;;  %v1745_v11 = vld [vmem:[%s2778_s3 + $0xa4] sm:$0xf]  ;;  %v1436_v14 = vor.u32 %v1781_v4, %v1433_v5 }
  0x1d   :  { %v1223_v27 = vld [vmem:[%s2778_s3 + $0x20] sm:$0xf]  ;;  %941 = vmatpush.bf16.msrb.mxu1 %v1384_v18  ;;  %v1368_v30 = vor.u32 %v1767_v23, %v1367_v22  ;;  %v1731_v31 = vld [vmem:[%s2778_s3 + $0x2c] sm:$0xf0]  ;;  %v1813_v12 = vld [vmem:[%s2778_s3 + $0x2c4] sm:$0xf] }
  0x1e   :  { %v1495_v28 = vld [vmem:[%s2778_s3 + $0x240] sm:$0xf]  ;;  %v1831_v33 = vld [vmem:[%s2778_s3 + $0x34c] sm:$0xf0]  ;;  %954 = vmatpush.bf16.msrb.mxu2 %v1512_v24  ;;  %v1224_v38 = vor.u32 %v1731_v31, %v1223_v27  ;;  %v1561_v13 = vld [vmem:[%s2778_s3 + $0x2d0] sm:$0xf0] }
  0x1f   :  { %v1623_v32 = vld [vmem:[%s2778_s3 + $0x340] sm:$0xf]  ;;  %v1763_v35 = vld [vmem:[%s2778_s3 + $0x12c] sm:$0xf0]  ;;  %v1496_v36 = vor.u32 %v1799_v29, %v1495_v28  ;;  %967 = vmatpush.bf16.msrb.mxu3 %v1640_v26  ;;  %v1289_v15 = vld [vmem:[%s2778_s3 + $0xb0] sm:$0xf0] }
  0x20   :  { %v1351_v34 = vld [vmem:[%s2778_s3 + $0x120] sm:$0xf]  ;;  %929 = vmatpush.bf16.msrb.mxu0 %v1240_v25  ;;  %v1624_v39 = vor.u32 %v1831_v33, %v1623_v32  ;;  %v1727_v40 = vld [vmem:[%s2778_s3 + $0xc] sm:$0xf0]  ;;  %v1845_v16 = vld [vmem:[%s2778_s3 + $0x3c4] sm:$0xf] }
  0x21   :  { %v1207_v37 = vld [vmem:[%s2778_s3] sm:$0xf]  ;;  %v1795_v42 = vld [vmem:[%s2778_s3 + $0x22c] sm:$0xf0]  ;;  %942 = vmatpush.bf16.msrb.mxu1 %v1368_v30  ;;  %v1352_v43 = vor.u32 %v1763_v35, %v1351_v34  ;;  %v1689_v17 = vld [vmem:[%s2778_s3 + $0x3d0] sm:$0xf0] }
  0x22   :  { %v1479_v41 = vld [vmem:[%s2778_s3 + $0x220] sm:$0xf]  ;;  %v1827_v46 = vld [vmem:[%s2778_s3 + $0x32c] sm:$0xf0]  ;;  %955 = vmatpush.bf16.msrb.mxu2 %v1496_v36  ;;  %v1208_v53 = vor.u32 %v1727_v40, %v1207_v37  ;;  %v1777_v18 = vld [vmem:[%s2778_s3 + $0x1a4] sm:$0xf] }
  0x23   :  { %v1335_v44 = vld [vmem:[%s2778_s3 + $0x100] sm:$0xf]  ;;  %v1759_v47 = vld [vmem:[%s2778_s3 + $0x10c] sm:$0xf0]  ;;  %v1480_v52 = vor.u32 %v1795_v42, %v1479_v41  ;;  %968 = vmatpush.bf16.msrb.mxu3 %v1624_v39  ;;  %v1417_v19 = vld [vmem:[%s2778_s3 + $0x1b0] sm:$0xf0] }
  0x24   :  { %v1607_v45 = vld [vmem:[%s2778_s3 + $0x320] sm:$0xf]  ;;  %930 = vmatpush.bf16.msrb.mxu0 %v1224_v38  ;;  %v1791_v57 = vld [vmem:[%s2778_s3 + $0x20c] sm:$0xf0]  ;;  %v1336_v59 = vor.u32 %v1759_v47, %v1335_v44 }
  0x25   :  { %v1608_v54 = vor.u32 %v1827_v46, %v1607_v45  ;;  %v1463_v56 = vld [vmem:[%s2778_s3 + $0x200] sm:$0xf]  ;;  %943 = vmatpush.bf16.msrb.mxu1 %v1352_v43  ;;  %v1823_v61 = vld [vmem:[%s2778_s3 + $0x30c] sm:$0xf0] }
  0x26   :  { %v1591_v58 = vld [vmem:[%s2778_s3 + $0x300] sm:$0xf]  ;;  %956 = vmatpush.bf16.msrb.mxu2 %v1480_v52  ;;  %v1464_v6 = vor.u32 %v1791_v57, %v1463_v56 }
  0x27   :  { %969 = vmatpush.bf16.msrb.mxu3 %v1608_v54  ;;  %v1592_v7 = vor.u32 %v1823_v61, %v1591_v58 }
  0x28   :  { %931 = vmatpush.bf16.msrb.mxu0 %v1208_v53 }
  0x29   :  { %944 = vmatpush.bf16.msrb.mxu1 %v1336_v59 }
  0x2a   :  { %957 = vmatpush.bf16.msrb.mxu2 %v1464_v6 }
  0x2c   :  { %976 = vmatpush.bf16.msra.mxu0 %v1324_v60 }
  0x2d   :  { %989 = vmatpush.bf16.msra.mxu1 %v1452_v0 }
  0x2e   :  { %10 = vsyncpa [#allocation3], 0  ;;  %970 = vmatpush.bf16.msrb.mxu3 %v1592_v7  ;;  %1002 = vmatpush.bf16.msra.mxu2 %v1580_v8  ;;  %v1564_v20 = vor.u32 %v1813_v12, %v1561_v13  ;;  %v1292_v21 = vor.u32 %v1745_v11, %v1289_v15  ;;  %v1692_v22 = vor.u32 %v1845_v16, %v1689_v17  ;;  %v1741_v23 = vld [vmem:[%s2778_s3 + $0x84] sm:$0xf]  ;;  %v1545_v25 = vld [vmem:[%s2778_s3 + $0x2b0] sm:$0xf0] }
  0x2f   :  { %v1809_v24 = vld [vmem:[%s2778_s3 + $0x2a4] sm:$0xf]  ;;  %v1420_v26 = vor.u32 %v1777_v18, %v1417_v19  ;;  %v1273_v27 = vld [vmem:[%s2778_s3 + $0x90] sm:$0xf0]  ;;  %s1160_s22 = sshll.u32 %s2780_s5, 4  ;;  %vm1151_vm1 = vcmask 949248   ;;  %s1161_s22 = int_to_ptr.hbm [resolvable:$true] %s1160_s22 }
  0x30   :  { %977 = vmatpush.bf16.msra.mxu0 %v1308_v9  ;;  %v1841_v28 = vld [vmem:[%s2778_s3 + $0x3a4] sm:$0xf]  ;;  %v1673_v29 = vld [vmem:[%s2778_s3 + $0x3b0] sm:$0xf0]  ;;  %v1548_v32 = vor.u32 %v1809_v24, %v1545_v25  ;;  %v1276_v33 = vor.u32 %v1741_v23, %v1273_v27 }
  0x31   :  { %990 = vmatpush.bf16.msra.mxu1 %v1436_v14  ;;  %v1773_v30 = vld [vmem:[%s2778_s3 + $0x184] sm:$0xf]  ;;  %v1401_v31 = vld [vmem:[%s2778_s3 + $0x190] sm:$0xf0]  ;;  %v1676_v34 = vor.u32 %v1841_v28, %v1673_v29 }
  0x32   :  { %1015 = vmatpush.bf16.msra.mxu3 %v1708_v10  ;;  %1003 = vmatpush.bf16.msra.mxu2 %v1564_v20  ;;  %v1737_v35 = vld [vmem:[%s2778_s3 + $0x64] sm:$0xf]  ;;  %v1529_v37 = vld [vmem:[%s2778_s3 + $0x290] sm:$0xf0]  ;;  %v1404_v38 = vor.u32 %v1773_v30, %v1401_v31 }
  0x33   :  { %v1805_v36 = vld [vmem:[%s2778_s3 + $0x284] sm:$0xf]  ;;  %v1257_v39 = vld [vmem:[%s2778_s3 + $0x70] sm:$0xf0] }
  0x34   :  { %978 = vmatpush.bf16.msra.mxu0 %v1292_v21  ;;  %v1837_v40 = vld [vmem:[%s2778_s3 + $0x384] sm:$0xf]  ;;  %v1657_v41 = vld [vmem:[%s2778_s3 + $0x390] sm:$0xf0]  ;;  %v1532_v44 = vor.u32 %v1805_v36, %v1529_v37  ;;  %v1260_v45 = vor.u32 %v1737_v35, %v1257_v39  ;;  %v1455_v35 = vld [vmem:[%s2778_s3 + $0x1e8] sm:$0xf] }
  0x35   :  { %991 = vmatpush.bf16.msra.mxu1 %v1420_v26  ;;  %v1769_v42 = vld [vmem:[%s2778_s3 + $0x164] sm:$0xf]  ;;  %v1385_v43 = vld [vmem:[%s2778_s3 + $0x170] sm:$0xf0]  ;;  %v1660_v46 = vor.u32 %v1837_v40, %v1657_v41  ;;  %v32_v26 = vld [vmem:[%s2777_s2] sm:$0xf] }
  0x36   :  { %1016 = vmatpush.bf16.msra.mxu3 %v1692_v22  ;;  %1004 = vmatpush.bf16.msra.mxu2 %v1548_v32  ;;  %v1388_v47 = vor.u32 %v1769_v42, %v1385_v43  ;;  %v1733_v48 = vld [vmem:[%s2778_s3 + $0x44] sm:$0xf]  ;;  %v1241_v49 = vld [vmem:[%s2778_s3 + $0x50] sm:$0xf0]  ;;  %v34_v27 = vperm.slane %v32_v26, 0  ;;  %v35_v28 = vperm.slane %v32_v26, 1 }
  0x37   :  { %v1765_v50 = vld [vmem:[%s2778_s3 + $0x144] sm:$0xf]  ;;  %v1369_v51 = vld [vmem:[%s2778_s3 + $0x150] sm:$0xf0]  ;;  %v1244_v52 = vor.u32 %v1733_v48, %v1241_v49  ;;  %v1327_v32 = vld [vmem:[%s2778_s3 + $0xe8] sm:$0xf] }
  0x38   :  { %979 = vmatpush.bf16.msra.mxu0 %v1276_v33  ;;  %v1372_v53 = vor.u32 %v1765_v50, %v1369_v51  ;;  %v1801_v54 = vld [vmem:[%s2778_s3 + $0x264] sm:$0xf]  ;;  %v1513_v55 = vld [vmem:[%s2778_s3 + $0x270] sm:$0xf0]  ;;  %v1756_v33 = vld [vmem:[%s2778_s3 + $0xf4] sm:$0xf0] }
  0x39   :  { %992 = vmatpush.bf16.msra.mxu1 %v1404_v38  ;;  %v1833_v56 = vld [vmem:[%s2778_s3 + $0x364] sm:$0xf]  ;;  %v1516_v57 = vor.u32 %v1801_v54, %v1513_v55  ;;  %v1641_v58 = vld [vmem:[%s2778_s3 + $0x370] sm:$0xf0]  ;;  %v1788_v36 = vld [vmem:[%s2778_s3 + $0x1f4] sm:$0xf0]  ;;  %v1328_v40 = vor.u32 %v1756_v33, %v1327_v32 }
  0x3a   :  { %1017 = vmatpush.bf16.msra.mxu3 %v1676_v34  ;;  %1005 = vmatpush.bf16.msra.mxu2 %v1532_v44  ;;  %v1644_v59 = vor.u32 %v1833_v56, %v1641_v58  ;;  %v1729_v60 = vld [vmem:[%s2778_s3 + $0x24] sm:$0xf]  ;;  %v1225_v61 = vld [vmem:[%s2778_s3 + $0x30] sm:$0xf0]  ;;  %v36_v39 = vperm.slane %v32_v26, 2  ;;  %v37_v42 = vperm.slane %v32_v26, 3  ;;  %v1456_v43 = vor.u32 %v1788_v36, %v1455_v35 }
  0x3b   :  { %v1228_v62 = vor.u32 %v1729_v60, %v1225_v61  ;;  %v1761_v63 = vld [vmem:[%s2778_s3 + $0x124] sm:$0xf]  ;;  %v1353_v0 = vld [vmem:[%s2778_s3 + $0x130] sm:$0xf0]  ;;  %v1311_v44 = vld [vmem:[%s2778_s3 + $0xc8] sm:$0xf] }
  0x3c   :  { %980 = vmatpush.bf16.msra.mxu0 %v1260_v45  ;;  %v1356_v1 = vor.u32 %v1761_v63, %v1353_v0  ;;  %v1797_v2 = vld [vmem:[%s2778_s3 + $0x244] sm:$0xf]  ;;  %v1497_v3 = vld [vmem:[%s2778_s3 + $0x250] sm:$0xf0]  ;;  %v1752_v45 = vld [vmem:[%s2778_s3 + $0xd4] sm:$0xf0] }
  0x3d   :  { %993 = vmatpush.bf16.msra.mxu1 %v1388_v47  ;;  %v1829_v4 = vld [vmem:[%s2778_s3 + $0x344] sm:$0xf]  ;;  %v1500_v5 = vor.u32 %v1797_v2, %v1497_v3  ;;  %v1625_v6 = vld [vmem:[%s2778_s3 + $0x350] sm:$0xf0]  ;;  %v1439_v47 = vld [vmem:[%s2778_s3 + $0x1c8] sm:$0xf] }
  0x3e   :  { %1018 = vmatpush.bf16.msra.mxu3 %v1660_v46  ;;  %1006 = vmatpush.bf16.msra.mxu2 %v1516_v57  ;;  %v1628_v7 = vor.u32 %v1829_v4, %v1625_v6  ;;  %v1725_v8 = vld [vmem:[%s2778_s3 + $0x4] sm:$0xf]  ;;  %v1209_v9 = vld [vmem:[%s2778_s3 + $0x10] sm:$0xf0]  ;;  %v1784_v48 = vld [vmem:[%s2778_s3 + $0x1d4] sm:$0xf0] }
  0x3f   :  { %v1757_v10 = vld [vmem:[%s2778_s3 + $0x104] sm:$0xf]  ;;  %v1212_v11 = vor.u32 %v1725_v8, %v1209_v9  ;;  %v1337_v12 = vld [vmem:[%s2778_s3 + $0x110] sm:$0xf0]  ;;  %v1583_v54 = vld [vmem:[%s2778_s3 + $0x2e8] sm:$0xf] }
  0x40   :  { %981 = vmatpush.bf16.msra.mxu0 %v1244_v52  ;;  %v1340_v13 = vor.u32 %v1757_v10, %v1337_v12  ;;  %v1793_v14 = vld [vmem:[%s2778_s3 + $0x224] sm:$0xf]  ;;  %v1481_v15 = vld [vmem:[%s2778_s3 + $0x230] sm:$0xf0]  ;;  %v1820_v55 = vld [vmem:[%s2778_s3 + $0x2f4] sm:$0xf0] }
  0x41   :  { %994 = vmatpush.bf16.msra.mxu1 %v1372_v53  ;;  %v1484_v16 = vor.u32 %v1793_v14, %v1481_v15  ;;  %v1825_v17 = vld [vmem:[%s2778_s3 + $0x324] sm:$0xf]  ;;  %v1609_v18 = vld [vmem:[%s2778_s3 + $0x330] sm:$0xf0]  ;;  %v1312_v53 = vor.u32 %v1752_v45, %v1311_v44  ;;  %v1711_v56 = vld [vmem:[%s2778_s3 + $0x3e8] sm:$0xf]  ;;  %v1584_v3 = vor.u32 %v1820_v55, %v1583_v54 }
  0x42   :  { %1019 = vmatpush.bf16.msra.mxu3 %v1644_v59  ;;  %1007 = vmatpush.bf16.msra.mxu2 %v1500_v5  ;;  %v1612_v19 = vor.u32 %v1825_v17, %v1609_v18  ;;  %v1789_v20 = vld [vmem:[%s2778_s3 + $0x204] sm:$0xf]  ;;  %v1465_v21 = vld [vmem:[%s2778_s3 + $0x210] sm:$0xf0]  ;;  %v1440_v59 = vor.u32 %v1784_v48, %v1439_v47  ;;  %v1852_v60 = vld [vmem:[%s2778_s3 + $0x3f4] sm:$0xf0] }
  0x43   :  { %v1468_v22 = vor.u32 %v1789_v20, %v1465_v21  ;;  %v1821_v23 = vld [vmem:[%s2778_s3 + $0x304] sm:$0xf]  ;;  %v1593_v24 = vld [vmem:[%s2778_s3 + $0x310] sm:$0xf0]  ;;  %v1295_v61 = vld [vmem:[%s2778_s3 + $0xa8] sm:$0xf]  ;;  %v1712_v5 = vor.u32 %v1852_v60, %v1711_v56 }
  0x44   :  { %982 = vmatpush.bf16.msra.mxu0 %v1228_v62  ;;  %v1596_v25 = vor.u32 %v1821_v23, %v1593_v24  ;;  %v1748_v62 = vld [vmem:[%s2778_s3 + $0xb4] sm:$0xf0]  ;;  %v1423_v0 = vld [vmem:[%s2778_s3 + $0x1a8] sm:$0xf] }
  0x45   :  { %995 = vmatpush.bf16.msra.mxu1 %v1356_v1  ;;  %v1780_v1 = vld [vmem:[%s2778_s3 + $0x1b4] sm:$0xf0]  ;;  %v1296_v6 = vor.u32 %v1748_v62, %v1295_v61  ;;  %v1695_v9 = vld [vmem:[%s2778_s3 + $0x3c8] sm:$0xf] }
  0x46   :  { %1020 = vmatpush.bf16.msra.mxu3 %v1628_v7  ;;  %1008 = vmatpush.bf16.msra.mxu2 %v1484_v16  ;;  %v1567_v7 = vld [vmem:[%s2778_s3 + $0x2c8] sm:$0xf]  ;;  %v1816_v8 = vld [vmem:[%s2778_s3 + $0x2d4] sm:$0xf0] }
  0x47   :  { %v1848_v12 = vld [vmem:[%s2778_s3 + $0x3d4] sm:$0xf0]  ;;  %v1407_v15 = vld [vmem:[%s2778_s3 + $0x188] sm:$0xf]  ;;  %v1568_v18 = vor.u32 %v1816_v8, %v1567_v7  ;;  %v1329_v8 = vld [vmem:[%s2778_s3 + $0xf8] sm:$0xf0] }
  0x48   :  { %983 = vmatpush.bf16.msra.mxu0 %v1212_v11  ;;  %v1424_v11 = vor.u32 %v1780_v1, %v1423_v0  ;;  %v1744_v14 = vld [vmem:[%s2778_s3 + $0x94] sm:$0xf0]  ;;  %v1696_v20 = vor.u32 %v1848_v12, %v1695_v9  ;;  %v1535_v33 = vld [vmem:[%s2778_s3 + $0x288] sm:$0xf]  ;;  %v1786_v9 = vld [vmem:[%s2778_s3 + $0x1ec] sm:$0xf] }
  0x49   :  { %996 = vmatpush.bf16.msra.mxu1 %v1340_v13  ;;  %v1279_v13 = vld [vmem:[%s2778_s3 + $0x88] sm:$0xf]  ;;  %v1776_v16 = vld [vmem:[%s2778_s3 + $0x194] sm:$0xf0] }
  0x4a   :  { %1021 = vmatpush.bf16.msra.mxu3 %v1612_v19  ;;  %1009 = vmatpush.bf16.msra.mxu2 %v1468_v22  ;;  %v1280_v21 = vor.u32 %v1744_v14, %v1279_v13  ;;  %v1551_v22 = vld [vmem:[%s2778_s3 + $0x2a8] sm:$0xf]  ;;  %v1812_v23 = vld [vmem:[%s2778_s3 + $0x2b4] sm:$0xf0]  ;;  %v1408_v24 = vor.u32 %v1776_v16, %v1407_v15 }
  0x4b   :  { %v1844_v26 = vld [vmem:[%s2778_s3 + $0x3b4] sm:$0xf0]  ;;  %v1519_v47 = vld [vmem:[%s2778_s3 + $0x268] sm:$0xf] }
  0x4c   :  { %v1804_v48 = vld [vmem:[%s2778_s3 + $0x274] sm:$0xf0]  ;;  %v1359_v55 = vld [vmem:[%s2778_s3 + $0x128] sm:$0xf] }
  0x4d   :  { %v1732_v54 = vld [vmem:[%s2778_s3 + $0x34] sm:$0xf0]  ;;  %v1631_v61 = vld [vmem:[%s2778_s3 + $0x348] sm:$0xf] }
  0x4e   :  { %1022 = vmatpush.bf16.msra.mxu3 %v1596_v25  ;;  %v1679_v25 = vld [vmem:[%s2778_s3 + $0x3a8] sm:$0xf]  ;;  %v1764_v56 = vld [vmem:[%s2778_s3 + $0x134] sm:$0xf0] }
  0x4f   :  { %v1680_v32 = vor.u32 %v1844_v26, %v1679_v25  ;;  %v1800_v60 = vld [vmem:[%s2778_s3 + $0x254] sm:$0xf0]  ;;  %v1215_v1 = vld [vmem:[%s2778_s3 + $0x8] sm:$0xf]  ;;  %v1441_v25 = vld [vmem:[%s2778_s3 + $0x1d8] sm:$0xf0] }
  0x50   :  { %v1832_v0 = vld [vmem:[%s2778_s3 + $0x354] sm:$0xf0]  ;;  %v1487_v13 = vld [vmem:[%s2778_s3 + $0x228] sm:$0xf] }
  0x51   :  { %v1632_v12 = vor.u32 %v1832_v0, %v1631_v61  ;;  %v1796_v14 = vld [vmem:[%s2778_s3 + $0x234] sm:$0xf0]  ;;  %v1681_v0 = vld [vmem:[%s2778_s3 + $0x3b8] sm:$0xf0] }
  0x88   :  { %v95_v29 = vpop.f32.mrf.mxu0 }
  0x89   :  { %v96_v30 = vadd.f32 %v95_v29, %v34_v27  ;;  %v108_v31 = vpop.f32.mrf.mxu1  ;;  %v1263_v27 = vld [vmem:[%s2778_s3 + $0x68] sm:$0xf] }
  0x8a   :  { %v109_v34 = vadd.f32 %v108_v31, %v35_v28  ;;  %v1740_v28 = vld [vmem:[%s2778_s3 + $0x74] sm:$0xf0]  ;;  %v1391_v29 = vld [vmem:[%s2778_s3 + $0x168] sm:$0xf]  ;;  %v1552_v31 = vor.u32 %v1812_v23, %v1551_v22  ;;  %v1488_v22 = vor.u32 %v1796_v14, %v1487_v13  ;;  %v1313_v23 = vld [vmem:[%s2778_s3 + $0xd8] sm:$0xf0] }
  0x8b   :  { %v138_v37 = vmax.f32 %v96_v30, 0.0  ;;  %v1772_v30 = vld [vmem:[%s2778_s3 + $0x174] sm:$0xf0]  ;;  %v1264_v35 = vor.u32 %v1740_v28, %v1263_v27  ;;  %v1471_v27 = vld [vmem:[%s2778_s3 + $0x208] sm:$0xf] }
  0x8c   :  { %v139_v38 = vmax.f32 %v109_v34, 0.0  ;;  %v1808_v34 = vld [vmem:[%s2778_s3 + $0x294] sm:$0xf0]  ;;  %v1392_v36 = vor.u32 %v1772_v30, %v1391_v29  ;;  %v1599_v29 = vld [vmem:[%s2778_s3 + $0x308] sm:$0xf] }
  0x8d   :  { %v2373_v41 = vpack.c.bf16 %v138_v37, %v138_v37  ;;  %v1663_v37 = vld [vmem:[%s2778_s3 + $0x388] sm:$0xf]  ;;  %v1536_v44 = vor.u32 %v1808_v34, %v1535_v33  ;;  %v1792_v28 = vld [vmem:[%s2778_s3 + $0x214] sm:$0xf0]  ;;  %v1838_v13 = vld [vmem:[%s2778_s3 + $0x38c] sm:$0xf] }
  0x8e   :  { %v2381_v46 = vpack.c.bf16 %v139_v38, %v139_v38  ;;  %v1840_v38 = vld [vmem:[%s2778_s3 + $0x394] sm:$0xf0]  ;;  %v1665_v14 = vld [vmem:[%s2778_s3 + $0x398] sm:$0xf0] }
  0x8f   :  { %932 = vmatmul.bf16.vlgmr.msrb.gmra.mxu0 %v2373_v41  ;;  %v1664_v45 = vor.u32 %v1840_v38, %v1663_v37  ;;  %v1824_v30 = vld [vmem:[%s2778_s3 + $0x314] sm:$0xf0]  ;;  %v1746_v37 = vld [vmem:[%s2778_s3 + $0xac] sm:$0xf]  ;;  %v1472_v38 = vor.u32 %v1792_v28, %v1471_v27  ;;  %v1233_v28 = vld [vmem:[%s2778_s3 + $0x38] sm:$0xf0] }
  0x90   :  { %v121_v49 = vpop.f32.mrf.mxu2  ;;  %945 = vmatmul.bf16.vlgmr.msrb.gmra.mxu1 %v2381_v46  ;;  %1028 = vmatpush.bf16.msrb.mxu0 %v1328_v40  ;;  %v97_v52 = vpop.f32.mrf.mxu0  ;;  %v1736_v40 = vld [vmem:[%s2778_s3 + $0x54] sm:$0xf0]  ;;  %v1730_v27 = vld [vmem:[%s2778_s3 + $0x2c] sm:$0xf] }
  0x91   :  { %v122_v50 = vadd.f32 %v121_v49, %v36_v39  ;;  %v134_v51 = vpop.f32.mrf.mxu3  ;;  %1041 = vmatpush.bf16.msrb.mxu1 %v1456_v43  ;;  %v110_v58 = vpop.f32.mrf.mxu1  ;;  %v1247_v39 = vld [vmem:[%s2778_s3 + $0x48] sm:$0xf]  ;;  %v1768_v43 = vld [vmem:[%s2778_s3 + $0x154] sm:$0xf0] }
  0x92   :  { %v135_v57 = vadd.f32 %v134_v51, %v37_v42  ;;  %v1375_v42 = vld [vmem:[%s2778_s3 + $0x148] sm:$0xf]  ;;  %v1248_v49 = vor.u32 %v1736_v40, %v1247_v39  ;;  %v1836_v52 = vld [vmem:[%s2778_s3 + $0x374] sm:$0xf0]  ;;  %v1297_v39 = vld [vmem:[%s2778_s3 + $0xb8] sm:$0xf0] }
  0x93   :  { %v140_v63 = vmax.f32 %v122_v50, 0.0  ;;  %v1376_v50 = vor.u32 %v1768_v43, %v1375_v42  ;;  %v1647_v51 = vld [vmem:[%s2778_s3 + $0x368] sm:$0xf]  ;;  %v1778_v40 = vld [vmem:[%s2778_s3 + $0x1ac] sm:$0xf]  ;;  %v1600_v43 = vor.u32 %v1824_v30, %v1599_v29 }
  0x94   :  { %v141_v2 = vmax.f32 %v135_v57, 0.0  ;;  %1029 = vmatpush.bf16.msrb.mxu0 %v1312_v53  ;;  %v1231_v53 = vld [vmem:[%s2778_s3 + $0x28] sm:$0xf]  ;;  %v1520_v57 = vor.u32 %v1804_v48, %v1519_v47  ;;  %v1648_v58 = vor.u32 %v1836_v52, %v1647_v51  ;;  %v1425_v42 = vld [vmem:[%s2778_s3 + $0x1b8] sm:$0xf0] }
  0x95   :  { %v2415_v4 = vpack.c.bf16 %v140_v63, %v140_v63  ;;  %1042 = vmatpush.bf16.msrb.mxu1 %v1440_v59  ;;  %v1503_v59 = vld [vmem:[%s2778_s3 + $0x248] sm:$0xf]  ;;  %v1232_v62 = vor.u32 %v1732_v54, %v1231_v53  ;;  %v1360_v63 = vor.u32 %v1764_v56, %v1359_v55  ;;  %v1814_v47 = vld [vmem:[%s2778_s3 + $0x2cc] sm:$0xf]  ;;  %v1569_v48 = vld [vmem:[%s2778_s3 + $0x2d8] sm:$0xf0] }
  0x96   :  { %v2426_v10 = vpack.c.bf16 %v141_v2, %v141_v2  ;;  %v1728_v2 = vld [vmem:[%s2778_s3 + $0x14] sm:$0xf0]  ;;  %v1504_v7 = vor.u32 %v1800_v60, %v1503_v59  ;;  %v1846_v51 = vld [vmem:[%s2778_s3 + $0x3cc] sm:$0xf]  ;;  %v1697_v52 = vld [vmem:[%s2778_s3 + $0x3d8] sm:$0xf0] }
  0x97   :  { %958 = vmatmul.bf16.vlgmr.msrb.gmra.mxu2 %v2415_v4  ;;  %v1216_v15 = vor.u32 %v1728_v2, %v1215_v1  ;;  %v1742_v53 = vld [vmem:[%s2778_s3 + $0x8c] sm:$0xf]  ;;  %v1281_v54 = vld [vmem:[%s2778_s3 + $0x98] sm:$0xf0] }
  0x98   :  { %971 = vmatmul.bf16.vlgmr.msrb.gmra.mxu3 %v2426_v10  ;;  %1054 = vmatpush.bf16.msrb.mxu2 %v1584_v3  ;;  %v123_v17 = vpop.f32.mrf.mxu2  ;;  %v1343_v3 = vld [vmem:[%s2778_s3 + $0x108] sm:$0xf]  ;;  %v1774_v55 = vld [vmem:[%s2778_s3 + $0x18c] sm:$0xf]  ;;  %v1409_v56 = vld [vmem:[%s2778_s3 + $0x198] sm:$0xf0]  ;;  %v1284_v61 = vor.u32 %v1742_v53, %v1281_v54 }
  0x99   :  { %1067 = vmatpush.bf16.msrb.mxu3 %v1712_v5  ;;  %v136_v19 = vpop.f32.mrf.mxu3  ;;  %1030 = vmatpush.bf16.msrb.mxu0 %v1296_v6  ;;  %v1760_v5 = vld [vmem:[%s2778_s3 + $0x114] sm:$0xf0]  ;;  %v1754_v6 = vld [vmem:[%s2778_s3 + $0xec] sm:$0xf]  ;;  %v1615_v17 = vld [vmem:[%s2778_s3 + $0x328] sm:$0xf] }
  0x9a   :  { %1043 = vmatpush.bf16.msrb.mxu1 %v1424_v11  ;;  %v1457_v11 = vld [vmem:[%s2778_s3 + $0x1f8] sm:$0xf0]  ;;  %v1344_v16 = vor.u32 %v1760_v5, %v1343_v3  ;;  %v1332_v19 = vor.u32 %v1754_v6, %v1329_v8  ;;  %v1810_v59 = vld [vmem:[%s2778_s3 + $0x2ac] sm:$0xf] }
  0x9b   :  { %v1553_v60 = vld [vmem:[%s2778_s3 + $0x2b8] sm:$0xf0]  ;;  %v1738_v1 = vld [vmem:[%s2778_s3 + $0x6c] sm:$0xf] }
  0x9c   :  { %1055 = vmatpush.bf16.msrb.mxu2 %v1568_v18  ;;  %v1828_v18 = vld [vmem:[%s2778_s3 + $0x334] sm:$0xf0]  ;;  %v1265_v2 = vld [vmem:[%s2778_s3 + $0x78] sm:$0xf0]  ;;  %v1770_v3 = vld [vmem:[%s2778_s3 + $0x16c] sm:$0xf]  ;;  %v1556_v6 = vor.u32 %v1810_v59, %v1553_v60 }
  0x9d   :  { %1068 = vmatpush.bf16.msrb.mxu3 %v1696_v20  ;;  %1031 = vmatpush.bf16.msrb.mxu0 %v1280_v21  ;;  %v1460_v20 = vor.u32 %v1786_v9, %v1457_v11  ;;  %v1750_v21 = vld [vmem:[%s2778_s3 + $0xcc] sm:$0xf]  ;;  %v1616_v26 = vor.u32 %v1828_v18, %v1615_v17  ;;  %v1393_v5 = vld [vmem:[%s2778_s3 + $0x178] sm:$0xf0]  ;;  %v1268_v11 = vor.u32 %v1738_v1, %v1265_v2 }
  0x9e   :  { %1044 = vmatpush.bf16.msrb.mxu1 %v1408_v24  ;;  %v1782_v24 = vld [vmem:[%s2778_s3 + $0x1cc] sm:$0xf]  ;;  %v1316_v33 = vor.u32 %v1750_v21, %v1313_v23  ;;  %v1537_v9 = vld [vmem:[%s2778_s3 + $0x298] sm:$0xf0] }
  0x9f   :  { %984 = vmatmul.bf16.vlgmr.msra.gmra.mxu0 %v2373_v41  ;;  %v1444_v34 = vor.u32 %v1782_v24, %v1441_v25  ;;  %v1806_v8 = vld [vmem:[%s2778_s3 + $0x28c] sm:$0xf]  ;;  %v1377_v18 = vld [vmem:[%s2778_s3 + $0x158] sm:$0xf0] }
  0xa0   :  { %1056 = vmatpush.bf16.msrb.mxu2 %v1552_v31  ;;  %997 = vmatmul.bf16.vlgmr.msra.gmra.mxu1 %v2381_v46  ;;  %v1818_v31 = vld [vmem:[%s2778_s3 + $0x2ec] sm:$0xf]  ;;  %v1361_v30 = vld [vmem:[%s2778_s3 + $0x138] sm:$0xf0] }
  0xa1   :  { %1069 = vmatpush.bf16.msrb.mxu3 %v1680_v32  ;;  %1032 = vmatpush.bf16.msrb.mxu0 %v1264_v35  ;;  %v1585_v32 = vld [vmem:[%s2778_s3 + $0x2f8] sm:$0xf0]  ;;  %v1850_v35 = vld [vmem:[%s2778_s3 + $0x3ec] sm:$0xf] }
  0xa2   :  { %1045 = vmatpush.bf16.msrb.mxu1 %v1392_v36  ;;  %v1713_v36 = vld [vmem:[%s2778_s3 + $0x3f8] sm:$0xf0]  ;;  %v1766_v17 = vld [vmem:[%s2778_s3 + $0x14c] sm:$0xf] }
  0xa3   :  { %v1802_v21 = vld [vmem:[%s2778_s3 + $0x26c] sm:$0xf]  ;;  %v1380_v24 = vor.u32 %v1766_v17, %v1377_v18 }
  0xa4   :  { %1057 = vmatpush.bf16.msrb.mxu2 %v1536_v44  ;;  %v1588_v44 = vor.u32 %v1818_v31, %v1585_v32  ;;  %v1834_v25 = vld [vmem:[%s2778_s3 + $0x36c] sm:$0xf] }
  0xa5   :  { %1070 = vmatpush.bf16.msrb.mxu3 %v1664_v45  ;;  %1033 = vmatpush.bf16.msrb.mxu0 %v1248_v49  ;;  %v1716_v45 = vor.u32 %v1850_v35, %v1713_v36  ;;  %v1300_v49 = vor.u32 %v1746_v37, %v1297_v39  ;;  %v1762_v29 = vld [vmem:[%s2778_s3 + $0x12c] sm:$0xf]  ;;  %v1236_v35 = vor.u32 %v1730_v27, %v1233_v28 }
  0xa6   :  { %1046 = vmatpush.bf16.msrb.mxu1 %v1376_v50  ;;  %v1428_v50 = vor.u32 %v1778_v40, %v1425_v42  ;;  %v1364_v36 = vor.u32 %v1762_v29, %v1361_v30  ;;  %v1830_v37 = vld [vmem:[%s2778_s3 + $0x34c] sm:$0xf]  ;;  %v1217_v40 = vld [vmem:[%s2778_s3 + $0x18] sm:$0xf0] }
  0xa7   :  { %1010 = vmatmul.bf16.vlgmr.msra.gmra.mxu2 %v2415_v4  ;;  %v1726_v39 = vld [vmem:[%s2778_s3 + $0xc] sm:$0xf] }
  0xa8   :  { %1023 = vmatmul.bf16.vlgmr.msra.gmra.mxu3 %v2426_v10  ;;  %1058 = vmatpush.bf16.msrb.mxu2 %v1520_v57  ;;  %v1572_v57 = vor.u32 %v1814_v47, %v1569_v48  ;;  %v1758_v42 = vld [vmem:[%s2778_s3 + $0x10c] sm:$0xf]  ;;  %v1489_v48 = vld [vmem:[%s2778_s3 + $0x238] sm:$0xf0] }
  0xa9   :  { %1071 = vmatpush.bf16.msrb.mxu3 %v1648_v58  ;;  %1034 = vmatpush.bf16.msrb.mxu0 %v1232_v62  ;;  %v1700_v58 = vor.u32 %v1846_v51, %v1697_v52  ;;  %v1412_v62 = vor.u32 %v1774_v55, %v1409_v56  ;;  %v1794_v47 = vld [vmem:[%s2778_s3 + $0x22c] sm:$0xf]  ;;  %v1617_v52 = vld [vmem:[%s2778_s3 + $0x338] sm:$0xf0] }
  0xaa   :  { %1047 = vmatpush.bf16.msrb.mxu1 %v1360_v63  ;;  %v1842_v63 = vld [vmem:[%s2778_s3 + $0x3ac] sm:$0xf]  ;;  %v1492_v53 = vor.u32 %v1794_v47, %v1489_v48  ;;  %v1473_v56 = vld [vmem:[%s2778_s3 + $0x218] sm:$0xf0] }
  0xab   :  { %v1826_v51 = vld [vmem:[%s2778_s3 + $0x32c] sm:$0xf] }
  0xac   :  { %1059 = vmatpush.bf16.msrb.mxu2 %v1504_v7  ;;  %v1684_v7 = vor.u32 %v1842_v63, %v1681_v0  ;;  %v1620_v54 = vor.u32 %v1826_v51, %v1617_v52  ;;  %v1790_v55 = vld [vmem:[%s2778_s3 + $0x20c] sm:$0xf] }
  0xad   :  { %1072 = vmatpush.bf16.msrb.mxu3 %v1632_v12  ;;  %1035 = vmatpush.bf16.msrb.mxu0 %v1216_v15  ;;  %v1396_v12 = vor.u32 %v1770_v3, %v1393_v5  ;;  %v1734_v15 = vld [vmem:[%s2778_s3 + $0x4c] sm:$0xf]  ;;  %v1476_v59 = vor.u32 %v1790_v55, %v1473_v56 }
  0xae   :  { %1048 = vmatpush.bf16.msrb.mxu1 %v1344_v16  ;;  %v1249_v16 = vld [vmem:[%s2778_s3 + $0x58] sm:$0xf0] }
  0xaf   :  { %v1252_v23 = vor.u32 %v1734_v15, %v1249_v16 }
  0xb0   :  { %1060 = vmatpush.bf16.msrb.mxu2 %v1488_v22  ;;  %1036 = vmatmul.bf16.vlgmr.msrb.gmra.mxu0 %v2373_v41  ;;  %v1521_v22 = vld [vmem:[%s2778_s3 + $0x278] sm:$0xf0] }
  0xb1   :  { %1080 = vmatpush.bf16.msra.mxu0 %v1332_v19  ;;  %1073 = vmatpush.bf16.msrb.mxu3 %v1616_v26  ;;  %v1540_v19 = vor.u32 %v1806_v8, %v1537_v9  ;;  %v1649_v26 = vld [vmem:[%s2778_s3 + $0x378] sm:$0xf0]  ;;  %v1524_v31 = vor.u32 %v1802_v21, %v1521_v22 }
  0xb2   :  { %1093 = vmatpush.bf16.msra.mxu1 %v1460_v20  ;;  %v1668_v20 = vor.u32 %v1838_v13, %v1665_v14  ;;  %v1652_v32 = vor.u32 %v1834_v25, %v1649_v26 }
  0xb3   :  { %1049 = vmatmul.bf16.vlgmr.msrb.gmra.mxu1 %v2381_v46 }
  0xb4   :  { %1061 = vmatpush.bf16.msrb.mxu2 %v1472_v38  ;;  %v1633_v38 = vld [vmem:[%s2778_s3 + $0x358] sm:$0xf0] }
  0xb5   :  { %1081 = vmatpush.bf16.msra.mxu0 %v1316_v33  ;;  %1074 = vmatpush.bf16.msrb.mxu3 %v1600_v43  ;;  %v1798_v33 = vld [vmem:[%s2778_s3 + $0x24c] sm:$0xf]  ;;  %v1345_v43 = vld [vmem:[%s2778_s3 + $0x118] sm:$0xf0] }
  0xb6   :  { %1094 = vmatpush.bf16.msra.mxu1 %v1444_v34  ;;  %v1505_v34 = vld [vmem:[%s2778_s3 + $0x258] sm:$0xf0] }
  0xb7   :  { %1062 = vmatmul.bf16.vlgmr.msrb.gmra.mxu2 %v2415_v4 }
  0xb8   :  { %1106 = vmatpush.bf16.msra.mxu2 %v1588_v44  ;;  %1075 = vmatmul.bf16.vlgmr.msrb.gmra.mxu3 %v2426_v10  ;;  %v1508_v44 = vor.u32 %v1798_v33, %v1505_v34 }
  0xb9   :  { %1119 = vmatpush.bf16.msra.mxu3 %v1716_v45  ;;  %1082 = vmatpush.bf16.msra.mxu0 %v1300_v49  ;;  %v1636_v45 = vor.u32 %v1830_v37, %v1633_v38  ;;  %v1220_v49 = vor.u32 %v1726_v39, %v1217_v40 }
  0xba   :  { %1095 = vmatpush.bf16.msra.mxu1 %v1428_v50  ;;  %v1348_v50 = vor.u32 %v1758_v42, %v1345_v43 }
  0xbc   :  { %1107 = vmatpush.bf16.msra.mxu2 %v1572_v57  ;;  %v1822_v57 = vld [vmem:[%s2778_s3 + $0x30c] sm:$0xf] }
  0xbd   :  { %1120 = vmatpush.bf16.msra.mxu3 %v1700_v58  ;;  %1083 = vmatpush.bf16.msra.mxu0 %v1284_v61  ;;  %v1601_v58 = vld [vmem:[%s2778_s3 + $0x318] sm:$0xf0]  ;;  %v274_v61 = vld [vmem:[%s2779_s4] sm:$0xf]  ;;  %s1888_s3 = smov [#allocation2]  }
  0xbe   :  { %1096 = vmatpush.bf16.msra.mxu1 %v1412_v62  ;;  %v1604_v60 = vor.u32 %v1822_v57, %v1601_v58  ;;  %v276_v0 = vperm.slane %v274_v61, 0  ;;  %v278_v27 = vperm.slane %v274_v61, 2  ;;  %v279_v51 = vperm.slane %v274_v61, 3  ;;  %s1158_s4 = sshll.u32 %s1888_s3, 4  ;;  %s1159_s4 = int_to_ptr.vmem [resolvable:$true] %s1158_s4 }
  0xc0   :  { %1108 = vmatpush.bf16.msra.mxu2 %v1556_v6 }
  0xc1   :  { %1121 = vmatpush.bf16.msra.mxu3 %v1684_v7  ;;  %1084 = vmatpush.bf16.msra.mxu0 %v1268_v11 }
  0xc2   :  { %1097 = vmatpush.bf16.msra.mxu1 %v1396_v12 }
  0xc4   :  { %1109 = vmatpush.bf16.msra.mxu2 %v1540_v19 }
  0xc5   :  { %1122 = vmatpush.bf16.msra.mxu3 %v1668_v20  ;;  %1085 = vmatpush.bf16.msra.mxu0 %v1252_v23 }
  0xc6   :  { %1098 = vmatpush.bf16.msra.mxu1 %v1380_v24 }
  0xc8   :  { %1110 = vmatpush.bf16.msra.mxu2 %v1524_v31 }
  0xc9   :  { %1123 = vmatpush.bf16.msra.mxu3 %v1652_v32  ;;  %1086 = vmatpush.bf16.msra.mxu0 %v1236_v35 }
  0xca   :  { %1099 = vmatpush.bf16.msra.mxu1 %v1364_v36 }
  0xcc   :  { %1111 = vmatpush.bf16.msra.mxu2 %v1508_v44 }
  0xcd   :  { %1124 = vmatpush.bf16.msra.mxu3 %v1636_v45  ;;  %1087 = vmatpush.bf16.msra.mxu0 %v1220_v49 }
  0xce   :  { %1100 = vmatpush.bf16.msra.mxu1 %v1348_v50 }
  0xd0   :  { %1112 = vmatpush.bf16.msra.mxu2 %v1492_v53  ;;  %1088 = vmatmul.bf16.vlgmr.msra.gmra.mxu0 %v2373_v41 }
  0xd1   :  { %1125 = vmatpush.bf16.msra.mxu3 %v1620_v54  ;;  %1101 = vmatmul.bf16.vlgmr.msra.gmra.mxu1 %v2381_v46 }
  0xd4   :  { %1113 = vmatpush.bf16.msra.mxu2 %v1476_v59 }
  0xd5   :  { %1126 = vmatpush.bf16.msra.mxu3 %v1604_v60 }
  0xd7   :  { %1114 = vmatmul.bf16.vlgmr.msra.gmra.mxu2 %v2415_v4 }
  0xd8   :  { %1127 = vmatmul.bf16.vlgmr.msra.gmra.mxu3 %v2426_v10  ;;  %v277_v10 = vperm.slane %v274_v61, 1 }
 0x10c   :  { %v933_v62 = vpop.f32.mrf.mxu0 }
 0x10d   :  { %v946_v63 = vpop.f32.mrf.mxu1  ;;  %v934_v1 = vadd.f32 %v933_v62, %v276_v0 }
 0x10f   :  { %v947_v41 = vadd.f32 %v946_v63, %v934_v1 }
 0x114   :  { %v935_v2 = vpop.f32.mrf.mxu0 }
 0x115   :  { %v948_v3 = vpop.f32.mrf.mxu1 }
 0x11a   :  { %v959_v5 = vpop.f32.mrf.mxu2 }
 0x11b   :  { %v960_v6 = vadd.f32 %v959_v5, %v947_v41  ;;  %v972_v46 = vpop.f32.mrf.mxu3 }
 0x11c   :  { %v985_v8 = vpop.f32.mrf.mxu0 }
 0x11d   :  { %v973_v7 = vadd.f32 %v972_v46, %v960_v6  ;;  %v998_v9 = vpop.f32.mrf.mxu1  ;;  %v986_v13 = vadd.f32 %v985_v8, %v277_v10 }
 0x11f   :  { %v1132_v4 = vmul.f32 0.5, %v973_v7  ;;  %v999_v18 = vadd.f32 %v998_v9, %v986_v13 }
 0x121   :  { %1854 = vtanh.f32 %v1132_v4 }
 0x122   :  { %v961_v11 = vpop.f32.mrf.mxu2 }
 0x123   :  { %v974_v12 = vpop.f32.mrf.mxu3 }
 0x124   :  { %v987_v14 = vpop.f32.mrf.mxu0 }
 0x125   :  { %v1000_v15 = vpop.f32.mrf.mxu1 }
 0x127   :  { %v1855_v16 = vpop.eup %1854 }
 0x128   :  { %v1140_v17 = vmul.f32 0.5, %v1855_v16 }
 0x12a   :  { %v1144_v19 = vadd.f32 0.5, %v1140_v17  ;;  %v1011_v20 = vpop.f32.mrf.mxu2 }
 0x12b   :  { %v1012_v21 = vadd.f32 %v1011_v20, %v999_v18  ;;  %v1024_v22 = vpop.f32.mrf.mxu3 }
 0x12c   :  { %1148 = vst [vmem:[#allocation2] sm:$0xff] %v1144_v19 }
 0x12d   :  { %v1025_v23 = vadd.f32 %v1024_v22, %v1012_v21  ;;  %v1037_v24 = vpop.f32.mrf.mxu0 }
 0x12e   :  { %v1038_v30 = vadd.f32 %v1037_v24, %v278_v27 }
 0x12f   :  { %v1133_v25 = vmul.f32 0.5, %v1025_v23 }
 0x130   :  { %v1050_v26 = vpop.f32.mrf.mxu1 }
 0x131   :  { %1856 = vtanh.f32 %v1133_v25  ;;  %v1051_v36 = vadd.f32 %v1050_v26, %v1038_v30 }
 0x132   :  { %v1013_v28 = vpop.f32.mrf.mxu2 }
 0x133   :  { %v1026_v29 = vpop.f32.mrf.mxu3 }
 0x135   :  { %v1039_v31 = vpop.f32.mrf.mxu0 }
 0x137   :  { %v1857_v32 = vpop.eup %1856 }
 0x138   :  { %v1052_v33 = vpop.f32.mrf.mxu1  ;;  %v1141_v34 = vmul.f32 0.5, %v1857_v32 }
 0x13a   :  { %v1145_v35 = vadd.f32 0.5, %v1141_v34  ;;  %v1063_v37 = vpop.f32.mrf.mxu2 }
 0x13b   :  { %v1076_v38 = vpop.f32.mrf.mxu3  ;;  %v1064_v39 = vadd.f32 %v1063_v37, %v1051_v36 }
 0x13c   :  { %1149 = vst [vmem:[#allocation2 + $0x8] sm:$0xff] %v1145_v35 }
 0x13d   :  { %v1077_v40 = vadd.f32 %v1076_v38, %v1064_v39 }
 0x13f   :  { %v1134_v42 = vmul.f32 0.5, %v1077_v40 }
 0x141   :  { %1858 = vtanh.f32 %v1134_v42 }
 0x142   :  { %v1065_v43 = vpop.f32.mrf.mxu2 }
 0x143   :  { %v1078_v44 = vpop.f32.mrf.mxu3 }
 0x147   :  { %v1859_v45 = vpop.eup %1858 }
 0x148   :  { %v1142_v47 = vmul.f32 0.5, %v1859_v45 }
 0x14a   :  { %v1146_v48 = vadd.f32 0.5, %v1142_v47 }
 0x14c   :  { %1150 = vst [vmem:[#allocation2 + $0x10] sm:$0xff] %v1146_v48 }
 0x14d   :  { %v1089_v49 = vpop.f32.mrf.mxu0 }
 0x14e   :  { %v1102_v50 = vpop.f32.mrf.mxu1  ;;  %v1090_v52 = vadd.f32 %v1089_v49, %v279_v51 }
 0x150   :  { %v1103_v55 = vadd.f32 %v1102_v50, %v1090_v52 }
 0x155   :  { %v1091_v53 = vpop.f32.mrf.mxu0 }
 0x156   :  { %v1104_v54 = vpop.f32.mrf.mxu1 }
 0x15a   :  { %v1115_v56 = vpop.f32.mrf.mxu2 }
 0x15b   :  { %v1116_v57 = vadd.f32 %v1115_v56, %v1103_v55  ;;  %v1128_v58 = vpop.f32.mrf.mxu3 }
 0x15d   :  { %v1129_v59 = vadd.f32 %v1128_v58, %v1116_v57 }
 0x15f   :  { %v1135_v60 = vmul.f32 0.5, %v1129_v59 }
 0x161   :  { %1860 = vtanh.f32 %v1135_v60 }
 0x162   :  { %v1117_v62 = vpop.f32.mrf.mxu2 }
 0x163   :  { %v1130_v63 = vpop.f32.mrf.mxu3 }
 0x167   :  { %v1861_v0 = vpop.eup %1860 }
 0x168   :  { %v1143_v61 = vmul.f32 0.5, %v1861_v0 }
 0x16a   :  { %v1147_v1 = vadd.f32 0.5, %v1143_v61 }
 0x16c   :  { %1152 = vst.msk [vmem:[#allocation2 + $0x18] sm:$0xff] %vm1151_vm1, %v1147_v1 }
 0x16d   :  { %1163 = dma.vmem_to_hbm [thread:$0]  %s1159_s4, 512, %s1161_s22, [#allocation3]  }
 0x16e   :  { %1886 = dma.done.wait [#allocation3], 512  }
 0x16f   :  { %1887 = vsyncadd [#allocation3], 4294966784 }
 0x170   :  { %1168 = vsyncpa [#allocation3], 1 }

</bundles_post_ra>
